<compile_context>
chip_gen: v5e
topology: v5e:2x2
jax: 0.10.0
libtpu: 0.0.40
codegen_flags: <defaults>
</compile_context>

<pallas_src>
import functools

import numpy as np
import jax
import jax.numpy as jnp
from jax import lax
from jax.experimental import pallas as pl
from jax.experimental.pallas import tpu as pltpu

_MAX_OPS = 4          # at most noise + blur + bright + contrast per segment
_KSIZE = 11
_HALO = 5
_OP_NOOP, _OP_NOISE, _OP_BLUR, _OP_BRIGHT, _OP_CONTR = 0, 1, 2, 3, 4


# ------------------------------ fused kernel ------------------------------- #

def _banded_blur_matrix(taps_ref, b, n):
    """(n, n) banded matrix M with M[i, k] = taps[(k - i) + 5] for |k-i| <= 5.

    M @ x applies the zero-padded 11-tap filter down every column of x, which
    together with x @ M (taps are symmetric) reproduces conv2d(img, outer(g,g),
    padding=5) exactly.
    """
    row = lax.broadcasted_iota(jnp.int32, (n, n), 0)
    col = lax.broadcasted_iota(jnp.int32, (n, n), 1)
    off = col - row
    band = jnp.zeros((n, n), jnp.float32)
    for t in range(_KSIZE):                      # static 11-term select sum (VPU)
        band = band + jnp.where(off == (t - _HALO), taps_ref[b, t], 0.0)
    return band


def _fused_aug_kernel(ops_ref, par_ref, taps_ref,      # SMEM tables
                      noise_ref, x_ref, o_ref):        # VMEM blocks
    b = pl.program_id(0)
    H, W = o_ref.shape
    out_dt = o_ref.dtype

    # Bring the slab into the VMEM-resident output block once; every selected
    # op below updates o_ref in place -> one HBM read + one HBM write / image.
    o_ref[...] = x_ref[...]

    def _apply_slot(s, carry):
        op = ops_ref[b, s]
        p = par_ref[b, s]

        # ---- noise: img + sigma * N(0, 1) ---------------------------------- #
        @pl.when(op == _OP_NOISE)
        def _():
            x = o_ref[...].astype(jnp.float32)
            o_ref[...] = (x + p * noise_ref[...]).astype(out_dt)

        # ---- 11x11 gaussian blur as two banded MXU matmuls ------------------ #
        @pl.when(op == _OP_BLUR)
        def _():
            x = o_ref[...].astype(jnp.float32)
            band_h = _banded_blur_matrix(taps_ref, b, H)
            band_w = band_h if H == W else _banded_blur_matrix(taps_ref, b, W)
            y = jnp.dot(band_h, x, preferred_element_type=jnp.float32)
            y = jnp.dot(y, band_w, preferred_element_type=jnp.float32)
            o_ref[...] = y.astype(out_dt)

        # ---- brightness: img * fac ------------------------------------------ #
        @pl.when(op == _OP_BRIGHT)
        def _():
            o_ref[...] = (o_ref[...].astype(jnp.float32) * p).astype(out_dt)

        # ---- contrast: (img - mean) * fac + mean, clamped to [min, max] ------ #
        @pl.when(op == _OP_CONTR)
        def _():
            x = o_ref[...].astype(jnp.float32)
            mean = jnp.mean(x)
            mn = jnp.min(x)
            mx = jnp.max(x)
            o_ref[...] = jnp.clip((x - mean) * p + mean, mn, mx).astype(out_dt)

        return carry

    # Rolled loop over schedule slots: each op body is emitted exactly once.
    lax.fori_loop(0, _MAX_OPS, _apply_slot, 0)


# ------------------------------ call builder ------------------------------- #

def _ceil(a, m):
    return -(-a // m) * m


def _vmem_limit_bytes(H, W, itemsize):
    hp, wp = _ceil(H, 8), _ceil(W, 128)
    slab_nat = hp * wp * itemsize
    slab_f32 = hp * wp * 4
    est = 2 * slab_f32                              # double-buffered noise input
    est += 2 * 2 * slab_nat                         # double-buffered image in + out
    est += (_ceil(H, 8) * _ceil(H, 128) + _ceil(W, 8) * _ceil(W, 128)) * 4  # bands
    est += 3 * slab_f32                             # in-kernel f32 temporaries
    est += 2 << 20                                  # headroom
    try:   # generation-aware cap (~85% of physical VMEM); fallback off-TPU
        cap = int(pltpu.get_tpu_info().vmem_capacity_bytes * 0.85)
    except Exception:
        cap = 48 * 1024 * 1024
    return int(min(max(est, 32 * 1024 * 1024), cap))


@functools.lru_cache(maxsize=None)
def _build_fused_aug(B, H, W, dtype_name):
    dtype = np.dtype(dtype_name)
    smem = pl.BlockSpec(memory_space=pltpu.MemorySpace.SMEM)
    noise_spec = pl.BlockSpec((None, H, W), lambda b: (b, 0, 0))
    img_spec = pl.BlockSpec((None, H, W), lambda b: (b, 0, 0))
    out_spec = pl.BlockSpec((None, H, W), lambda b: (b, 0, 0))
    grid_spec = pltpu.PrefetchScalarGridSpec(
        num_scalar_prefetch=0,
        grid=(B,),
        in_specs=[smem, smem, smem, noise_spec, img_spec],
        out_specs=out_spec,
    )
    fn = pl.pallas_call(
        _fused_aug_kernel,
        out_shape=jax.ShapeDtypeStruct((B, H, W), dtype),
        grid_spec=grid_spec,
        input_output_aliases={4: 0},                # image input -> output slab
        compiler_params=pltpu.CompilerParams(
            dimension_semantics=("parallel",),      # batch -> 2 TCs on v7x
            vmem_limit_bytes=_vmem_limit_bytes(H, W, dtype.itemsize),
        ),
    )
    return jax.jit(fn)


# ------------------------------- module port -------------------------------- #

class GrayValueAugmentationPallas:
    """Port of torch_gray_value_augmentation (forward pass)."""

    def __init__(self, p_noise=0.15, p_blur=0.1, p_bright=0.15, p_contr=0.15,
                 p_low_res=0.125, p_gamma=0.15, p_gamma_invert=0.15,
                 mm_var_noise=(0.0, 0.1), mm_sigma_blur=(0.5, 1.5),
                 mm_bright=(0.7, 1.3), mm_contr=(0.65, 1.5),
                 mm_low_res=(1.0, 2.0), mm_gamma=(0.7, 1.5),
                 n_im_channels=1, regress=False, seed=0):
        self.p_noise = p_noise
        self.p_blur = p_blur
        self.p_bright = p_bright
        self.p_contr = p_contr
        self.p_low_res = p_low_res
        self.p_gamma = p_gamma                # never used in forward()
        self.p_gamma_invert = p_gamma_invert  # (same as the PyTorch module)
        self.mm_var_noise = mm_var_noise
        self.mm_sigma_blur = mm_sigma_blur
        self.mm_bright = mm_bright
        self.mm_contr = mm_contr
        self.mm_low_res = mm_low_res
        self.mm_gamma = mm_gamma
        self.n_im_channels = n_im_channels
        self.regress = regress
        self._rng = np.random.default_rng(seed)   # replaces torch/np RNG

    # -- host-side RNG helpers -- #
    def _uniform(self, mm):
        return float((mm[1] - mm[0]) * self._rng.random() + mm[0])

    @staticmethod
    def _gauss_taps_1d(sigma):
        ax = np.arange(-_HALO, _HALO + 1, dtype=np.float64)
        g = np.exp(-(ax ** 2) / (2.0 * float(sigma) ** 2))
        return (g / g.sum()).astype(np.float32)   # outer(g,g) == torch 11x11 kernel

    def _draw_schedules(self, B):
        """Per-batch op schedules (host control flow, mirrors _get_ops_list)."""
        pre = [[] for _ in range(B)]
        post = [[] for _ in range(B)]
        low_res = []                                   # (batch index, factor)
        for b in range(B):
            names = []
            if self._rng.random() < self.p_noise:
                names.append("noise")
            if self._rng.random() < self.p_blur:
                names.append("blur")
            if self._rng.random() < self.p_bright:
                names.append("bright")
            if self._rng.random() < self.p_contr:
                names.append("contrast")
            if self._rng.random() < self.p_low_res:
                names.append("low_res")
            self._rng.shuffle(names)
            seg = pre[b]
            for name in names:
                if name == "low_res":
                    low_res.append((b, float(self._rng.uniform(*self.mm_low_res))))
                    seg = post[b]          # ops after low_res go to 2nd segment
                elif name == "noise":
                    sigma = float(np.sqrt(self._uniform(self.mm_var_noise)))
                    seg.append((_OP_NOISE, sigma, None))
                elif name == "blur":
                    taps = self._gauss_taps_1d(self._uniform(self.mm_sigma_blur))
                    seg.append((_OP_BLUR, 0.0, taps))
                elif name == "bright":
                    seg.append((_OP_BRIGHT, self._uniform(self.mm_bright), None))
                elif name == "contrast":
                    seg.append((_OP_CONTR, self._uniform(self.mm_contr), None))
        return pre, post, low_res

    # -- fused Pallas segment over the whole batch -- #
    def _run_fused(self, x0, segments):
        B, H, W = x0.shape
        ops = np.zeros((B, _MAX_OPS), np.int32)
        par = np.zeros((B, _MAX_OPS), np.float32)
        taps = np.zeros((B, _KSIZE), np.float32)
        has_noise = False
        for b, seg in enumerate(segments):
            for s, (op_id, p, t) in enumerate(seg):
                ops[b, s] = op_id
                par[b, s] = p
                if op_id == _OP_NOISE:
                    has_noise = True
                if t is not None:
                    taps[b] = t
        if has_noise:
            seed = int(self._rng.integers(0, 2 ** 31 - 1))
            noise = jax.random.normal(jax.random.PRNGKey(seed), (B, H, W),
                                      dtype=jnp.float32)
        else:
            noise = jnp.zeros((B, H, W), jnp.float32)
        call = _build_fused_aug(B, H, W, str(x0.dtype))
        return call(jnp.asarray(ops), jnp.asarray(par), jnp.asarray(taps),
                    noise, x0)

    # -- low_res host segment (bucketed sizes, same-size images batched) -- #
    def _apply_low_res(self, x0, low_res):
        # TODO(synk): torch interpolate (nearest down + bilinear up with
        # data-dependent sizes) has no clean Pallas equivalent; plain JAX with
        # sizes bucketed to multiples of 8 to bound jit-cache growth.
        if not low_res:
            return x0
        B, H, W = x0.shape

        def _bucket(n, full):
            if full < 8:
                return max(1, min(n, full))
            return int(np.clip(int(round(n / 8.0)) * 8, 8, full))

        groups = {}
        for b, fac in low_res:
            nh = _bucket(max(1, int(H / fac)), H)
            nw = _bucket(max(1, int(W / fac)), W)
            groups.setdefault((nh, nw), []).append(b)
        for (nh, nw), idxs in groups.items():
            if (nh, nw) == (H, W):
                continue                                   # identity resize
            idx = jnp.asarray(idxs, jnp.int32)
            sel = x0[idx]                                  # (n, H, W)
            small = jax.image.resize(sel, (len(idxs), nh, nw), method="nearest")
            up = jax.image.resize(small, (len(idxs), H, W), method="linear")
            x0 = x0.at[idx].set(up.astype(x0.dtype))
        return x0

    # -- forward -- #
    def forward(self, xb):
        c = self.n_im_channels
        # The original 4-D blur uses a (1, 1, 11, 11) conv kernel => a single
        # image channel; keep the same constraint as the default module.
        assert c == 1, "n_im_channels must be 1 (as in the default module)"
        B, _, H, W = xb.shape

        pre, post, low_res = self._draw_schedules(B)

        x0 = xb[:, 0]                                   # (B, H, W), native dtype
        if any(len(s) > 0 for s in pre):
            x0 = self._run_fused(x0, pre)
        x0 = self._apply_low_res(x0, low_res)
        if any(len(s) > 0 for s in post):
            x0 = self._run_fused(x0, post)

        xb = xb.at[:, 0].set(x0.astype(xb.dtype))
        if self.regress:
            xb = xb.at[:, c].set(xb[:, 0] - xb[:, c])
        return xb

    __call__ = forward


# ----------------------------------- main ----------------------------------- #

if __name__ == "__main__":
    key = jax.random.PRNGKey(0)
    x = jax.random.normal(key, (2, 2, 16, 16), dtype=jnp.float32)   # NCHW

    # Probabilities set to 1.0 so every augmentation path (noise, blur,
    # brightness, contrast, low-res split) is exercised deterministically;
    # all other defaults match the PyTorch module.
    aug = GrayValueAugmentationPallas(p_noise=1.0, p_blur=1.0, p_bright=1.0,
                                      p_contr=1.0, p_low_res=1.0, seed=0)
    y = aug(x)
    y = jax.block_until_ready(y)

    assert y.shape == x.shape and y.dtype == x.dtype
    assert bool(jnp.all(jnp.isfinite(y)))
    # channels >= n_im_channels are untouched (regress=False)
    assert bool(jnp.array_equal(y[:, 1], x[:, 1]))
    print("KERNEL_OK")
</pallas_src>

<mosaic_0001>
module attributes {stable_mosaic.version = 11 : i64} {
  func.func @_fused_aug_kernel(%arg0: i32, %arg1: memref<2x4xi32, #tpu.memory_space<smem>>, %arg2: memref<2x4xf32, #tpu.memory_space<smem>>, %arg3: memref<2x11xf32, #tpu.memory_space<smem>>, %arg4: memref<1x16x16xf32, #tpu.memory_space<vmem>>, %arg5: memref<1x16x16xf32, #tpu.memory_space<vmem>>, %arg6: memref<1x16x16xf32, #tpu.memory_space<vmem>>) attributes {dimension_semantics = [#tpu.dimension_semantics<parallel>], iteration_bounds = array<i64: 2>, scalar_prefetch = 0 : i64, scratch_operands = 0 : i64, tpu.core_type = #tpu.core_type<tc>, window_params = [{transform_indices = @transform_0, window_bounds = array<i64: 2, 4>}, {transform_indices = @transform_1, window_bounds = array<i64: 2, 4>}, {transform_indices = @transform_2, window_bounds = array<i64: 2, 11>}, {transform_indices = @transform_3, window_bounds = array<i64: 1, 16, 16>}, {transform_indices = @transform_4, window_bounds = array<i64: 1, 16, 16>}, {transform_indices = @transform_5, window_bounds = array<i64: 1, 16, 16>}]} {
    %c0 = arith.constant 0 : index
    %c0_0 = arith.constant 0 : index
    %c0_1 = arith.constant 0 : index
    %0 = vector.load %arg5[%c0, %c0_0, %c0_1] : memref<1x16x16xf32, #tpu.memory_space<vmem>>, vector<1x16x16xf32>
    %1 = vector.shape_cast %0 : vector<1x16x16xf32> to vector<16x16xf32>
    %c0_2 = arith.constant 0 : index
    %c0_3 = arith.constant 0 : index
    %c0_4 = arith.constant 0 : index
    %2 = vector.load %arg6[%c0_2, %c0_3, %c0_4] : memref<1x16x16xf32, #tpu.memory_space<vmem>>, vector<1x16x16xf32>
    %3 = vector.shape_cast %2 : vector<1x16x16xf32> to vector<16x16xf32>
    %4 = vector.shape_cast %1 : vector<16x16xf32> to vector<1x16x16xf32>
    tpu.vector_store %arg6[%c0_2, %c0_3, %c0_4], %4 {strides = array<i32>} : memref<1x16x16xf32, #tpu.memory_space<vmem>>, vector<1x16x16xf32>,
    %c0_i32 = arith.constant 0 : i32
    %c4_i32 = arith.constant 4 : i32
    %5 = arith.addi %c0_i32, %c4_i32 : i32
    %c1_i32 = arith.constant 1 : i32
    scf.for %arg7 = %c0_i32 to %5 step %c1_i32  : i32 {
      %6 = arith.index_cast %arg0 : i32 to index
      %7 = arith.index_cast %arg7 : i32 to index
      %8 = memref.load %arg1[%6, %7] : memref<2x4xi32, #tpu.memory_space<smem>>
      %9 = arith.index_cast %arg0 : i32 to index
      %10 = arith.index_cast %arg7 : i32 to index
      %11 = memref.load %arg2[%9, %10] : memref<2x4xf32, #tpu.memory_space<smem>>
      %c1_i32_6 = arith.constant 1 : i32
      %12 = arith.cmpi eq, %8, %c1_i32_6 : i32
      %13 = arith.extui %12 : i1 to i32
      %c0_i32_7 = arith.constant 0 : i32
      %14 = arith.cmpi ne, %13, %c0_i32_7 : i32
      scf.if %14 {
        %c0_12 = arith.constant 0 : index
        %c0_13 = arith.constant 0 : index
        %c0_14 = arith.constant 0 : index
        %24 = vector.load %arg6[%c0_12, %c0_13, %c0_14] : memref<1x16x16xf32, #tpu.memory_space<vmem>>, vector<1x16x16xf32>
        %25 = vector.shape_cast %24 : vector<1x16x16xf32> to vector<16x16xf32>
        %c0_15 = arith.constant 0 : index
        %c0_16 = arith.constant 0 : index
        %c0_17 = arith.constant 0 : index
        %26 = vector.load %arg4[%c0_15, %c0_16, %c0_17] : memref<1x16x16xf32, #tpu.memory_space<vmem>>, vector<1x16x16xf32>
        %27 = vector.shape_cast %26 : vector<1x16x16xf32> to vector<16x16xf32>
        %28 = vector.broadcast %11 : f32 to vector<16x16xf32>
        %29 = arith.mulf %28, %27 : vector<16x16xf32>
        %30 = arith.addf %25, %29 : vector<16x16xf32>
        %c0_18 = arith.constant 0 : index
        %c0_19 = arith.constant 0 : index
        %c0_20 = arith.constant 0 : index
        %31 = vector.load %arg6[%c0_18, %c0_19, %c0_20] : memref<1x16x16xf32, #tpu.memory_space<vmem>>, vector<1x16x16xf32>
        %32 = vector.shape_cast %31 : vector<1x16x16xf32> to vector<16x16xf32>
        %33 = vector.shape_cast %30 : vector<16x16xf32> to vector<1x16x16xf32>
        tpu.vector_store %arg6[%c0_18, %c0_19, %c0_20], %33 {strides = array<i32>} : memref<1x16x16xf32, #tpu.memory_space<vmem>>, vector<1x16x16xf32>,
      } else {
      }
      %c2_i32 = arith.constant 2 : i32
      %15 = arith.cmpi eq, %8, %c2_i32 : i32
      %16 = arith.extui %15 : i1 to i32
      %c0_i32_8 = arith.constant 0 : i32
      %17 = arith.cmpi ne, %16, %c0_i32_8 : i32
      scf.if %17 {
        %c0_12 = arith.constant 0 : index
        %c0_13 = arith.constant 0 : index
        %c0_14 = arith.constant 0 : index
        %24 = vector.load %arg6[%c0_12, %c0_13, %c0_14] : memref<1x16x16xf32, #tpu.memory_space<vmem>>, vector<1x16x16xf32>
        %25 = vector.shape_cast %24 : vector<1x16x16xf32> to vector<16x16xf32>
        %26 = tpu.iota {dimensions = array<i32: 0>} : vector<16x16xi32>
        %27 = tpu.iota {dimensions = array<i32: 1>} : vector<16x16xi32>
        %28 = arith.subi %27, %26 : vector<16x16xi32>
        %cst = arith.constant 0.000000e+00 : f32
        %29 = vector.broadcast %cst : f32 to vector<16x16xf32>
        %c-5_i32 = arith.constant -5 : i32
        %30 = vector.broadcast %c-5_i32 : i32 to vector<16x16xi32>
        %31 = arith.cmpi eq, %28, %30 : vector<16x16xi32>
        %32 = arith.index_cast %arg0 : i32 to index
        %c0_15 = arith.constant 0 : index
        %33 = memref.load %arg3[%32, %c0_15] : memref<2x11xf32, #tpu.memory_space<smem>>
        %cst_16 = arith.constant 0.000000e+00 : f32
        %34 = vector.broadcast %33 : f32 to vector<16x16xf32>
        %35 = vector.broadcast %cst_16 : f32 to vector<16x16xf32>
        %36 = arith.select %31, %34, %35 : vector<16x16xi1>, vector<16x16xf32>
        %37 = arith.addf %29, %36 : vector<16x16xf32>
        %c-4_i32 = arith.constant -4 : i32
        %38 = vector.broadcast %c-4_i32 : i32 to vector<16x16xi32>
        %39 = arith.cmpi eq, %28, %38 : vector<16x16xi32>
        %40 = arith.index_cast %arg0 : i32 to index
        %c1 = arith.constant 1 : index
        %41 = memref.load %arg3[%40, %c1] : memref<2x11xf32, #tpu.memory_space<smem>>
        %cst_17 = arith.constant 0.000000e+00 : f32
        %42 = vector.broadcast %41 : f32 to vector<16x16xf32>
        %43 = vector.broadcast %cst_17 : f32 to vector<16x16xf32>
        %44 = arith.select %39, %42, %43 : vector<16x16xi1>, vector<16x16xf32>
        %45 = arith.addf %37, %44 : vector<16x16xf32>
        %c-3_i32 = arith.constant -3 : i32
        %46 = vector.broadcast %c-3_i32 : i32 to vector<16x16xi32>
        %47 = arith.cmpi eq, %28, %46 : vector<16x16xi32>
        %48 = arith.index_cast %arg0 : i32 to index
        %c2 = arith.constant 2 : index
        %49 = memref.load %arg3[%48, %c2] : memref<2x11xf32, #tpu.memory_space<smem>>
        %cst_18 = arith.constant 0.000000e+00 : f32
        %50 = vector.broadcast %49 : f32 to vector<16x16xf32>
        %51 = vector.broadcast %cst_18 : f32 to vector<16x16xf32>
        %52 = arith.select %47, %50, %51 : vector<16x16xi1>, vector<16x16xf32>
        %53 = arith.addf %45, %52 : vector<16x16xf32>
        %c-2_i32 = arith.constant -2 : i32
        %54 = vector.broadcast %c-2_i32 : i32 to vector<16x16xi32>
        %55 = arith.cmpi eq, %28, %54 : vector<16x16xi32>
        %56 = arith.index_cast %arg0 : i32 to index
        %c3 = arith.constant 3 : index
        %57 = memref.load %arg3[%56, %c3] : memref<2x11xf32, #tpu.memory_space<smem>>
        %cst_19 = arith.constant 0.000000e+00 : f32
        %58 = vector.broadcast %57 : f32 to vector<16x16xf32>
        %59 = vector.broadcast %cst_19 : f32 to vector<16x16xf32>
        %60 = arith.select %55, %58, %59 : vector<16x16xi1>, vector<16x16xf32>
        %61 = arith.addf %53, %60 : vector<16x16xf32>
        %c-1_i32 = arith.constant -1 : i32
        %62 = vector.broadcast %c-1_i32 : i32 to vector<16x16xi32>
        %63 = arith.cmpi eq, %28, %62 : vector<16x16xi32>
        %64 = arith.index_cast %arg0 : i32 to index
        %c4 = arith.constant 4 : index
        %65 = memref.load %arg3[%64, %c4] : memref<2x11xf32, #tpu.memory_space<smem>>
        %cst_20 = arith.constant 0.000000e+00 : f32
        %66 = vector.broadcast %65 : f32 to vector<16x16xf32>
        %67 = vector.broadcast %cst_20 : f32 to vector<16x16xf32>
        %68 = arith.select %63, %66, %67 : vector<16x16xi1>, vector<16x16xf32>
        %69 = arith.addf %61, %68 : vector<16x16xf32>
        %c0_i32_21 = arith.constant 0 : i32
        %70 = vector.broadcast %c0_i32_21 : i32 to vector<16x16xi32>
        %71 = arith.cmpi eq, %28, %70 : vector<16x16xi32>
        %72 = arith.index_cast %arg0 : i32 to index
        %c5 = arith.constant 5 : index
        %73 = memref.load %arg3[%72, %c5] : memref<2x11xf32, #tpu.memory_space<smem>>
        %cst_22 = arith.constant 0.000000e+00 : f32
        %74 = vector.broadcast %73 : f32 to vector<16x16xf32>
        %75 = vector.broadcast %cst_22 : f32 to vector<16x16xf32>
        %76 = arith.select %71, %74, %75 : vector<16x16xi1>, vector<16x16xf32>
        %77 = arith.addf %69, %76 : vector<16x16xf32>
        %c1_i32_23 = arith.constant 1 : i32
        %78 = vector.broadcast %c1_i32_23 : i32 to vector<16x16xi32>
        %79 = arith.cmpi eq, %28, %78 : vector<16x16xi32>
        %80 = arith.index_cast %arg0 : i32 to index
        %c6 = arith.constant 6 : index
        %81 = memref.load %arg3[%80, %c6] : memref<2x11xf32, #tpu.memory_space<smem>>
        %cst_24 = arith.constant 0.000000e+00 : f32
        %82 = vector.broadcast %81 : f32 to vector<16x16xf32>
        %83 = vector.broadcast %cst_24 : f32 to vector<16x16xf32>
        %84 = arith.select %79, %82, %83 : vector<16x16xi1>, vector<16x16xf32>
        %85 = arith.addf %77, %84 : vector<16x16xf32>
        %c2_i32_25 = arith.constant 2 : i32
        %86 = vector.broadcast %c2_i32_25 : i32 to vector<16x16xi32>
        %87 = arith.cmpi eq, %28, %86 : vector<16x16xi32>
        %88 = arith.index_cast %arg0 : i32 to index
        %c7 = arith.constant 7 : index
        %89 = memref.load %arg3[%88, %c7] : memref<2x11xf32, #tpu.memory_space<smem>>
        %cst_26 = arith.constant 0.000000e+00 : f32
        %90 = vector.broadcast %89 : f32 to vector<16x16xf32>
        %91 = vector.broadcast %cst_26 : f32 to vector<16x16xf32>
        %92 = arith.select %87, %90, %91 : vector<16x16xi1>, vector<16x16xf32>
        %93 = arith.addf %85, %92 : vector<16x16xf32>
        %c3_i32_27 = arith.constant 3 : i32
        %94 = vector.broadcast %c3_i32_27 : i32 to vector<16x16xi32>
        %95 = arith.cmpi eq, %28, %94 : vector<16x16xi32>
        %96 = arith.index_cast %arg0 : i32 to index
        %c8 = arith.constant 8 : index
        %97 = memref.load %arg3[%96, %c8] : memref<2x11xf32, #tpu.memory_space<smem>>
        %cst_28 = arith.constant 0.000000e+00 : f32
        %98 = vector.broadcast %97 : f32 to vector<16x16xf32>
        %99 = vector.broadcast %cst_28 : f32 to vector<16x16xf32>
        %100 = arith.select %95, %98, %99 : vector<16x16xi1>, vector<16x16xf32>
        %101 = arith.addf %93, %100 : vector<16x16xf32>
        %c4_i32_29 = arith.constant 4 : i32
        %102 = vector.broadcast %c4_i32_29 : i32 to vector<16x16xi32>
        %103 = arith.cmpi eq, %28, %102 : vector<16x16xi32>
        %104 = arith.index_cast %arg0 : i32 to index
        %c9 = arith.constant 9 : index
        %105 = memref.load %arg3[%104, %c9] : memref<2x11xf32, #tpu.memory_space<smem>>
        %cst_30 = arith.constant 0.000000e+00 : f32
        %106 = vector.broadcast %105 : f32 to vector<16x16xf32>
        %107 = vector.broadcast %cst_30 : f32 to vector<16x16xf32>
        %108 = arith.select %103, %106, %107 : vector<16x16xi1>, vector<16x16xf32>
        %109 = arith.addf %101, %108 : vector<16x16xf32>
        %c5_i32 = arith.constant 5 : i32
        %110 = vector.broadcast %c5_i32 : i32 to vector<16x16xi32>
        %111 = arith.cmpi eq, %28, %110 : vector<16x16xi32>
        %112 = arith.index_cast %arg0 : i32 to index
        %c10 = arith.constant 10 : index
        %113 = memref.load %arg3[%112, %c10] : memref<2x11xf32, #tpu.memory_space<smem>>
        %cst_31 = arith.constant 0.000000e+00 : f32
        %114 = vector.broadcast %113 : f32 to vector<16x16xf32>
        %115 = vector.broadcast %cst_31 : f32 to vector<16x16xf32>
        %116 = arith.select %111, %114, %115 : vector<16x16xi1>, vector<16x16xf32>
        %117 = arith.addf %109, %116 : vector<16x16xf32>
        %cst_32 = arith.constant dense<0.000000e+00> : vector<16x16xf32>
        %118 = tpu.matmul %117, %25, %cst_32 {dimension_numbers = #tpu.dot_dimension_numbers<[1], [0], [0], [1], [0, 0, 1, 1], [], []>} : vector<16x16xf32>, vector<16x16xf32>, vector<16x16xf32> -> vector<16x16xf32>
        %cst_33 = arith.constant dense<0.000000e+00> : vector<16x16xf32>
        %119 = tpu.matmul %118, %117, %cst_33 {dimension_numbers = #tpu.dot_dimension_numbers<[1], [0], [0], [1], [0, 0, 1, 1], [], []>} : vector<16x16xf32>, vector<16x16xf32>, vector<16x16xf32> -> vector<16x16xf32>
        %c0_34 = arith.constant 0 : index
        %c0_35 = arith.constant 0 : index
        %c0_36 = arith.constant 0 : index
        %120 = vector.load %arg6[%c0_34, %c0_35, %c0_36] : memref<1x16x16xf32, #tpu.memory_space<vmem>>, vector<1x16x16xf32>
        %121 = vector.shape_cast %120 : vector<1x16x16xf32> to vector<16x16xf32>
        %122 = vector.shape_cast %119 : vector<16x16xf32> to vector<1x16x16xf32>
        tpu.vector_store %arg6[%c0_34, %c0_35, %c0_36], %122 {strides = array<i32>} : memref<1x16x16xf32, #tpu.memory_space<vmem>>, vector<1x16x16xf32>,
      } else {
      }
      %c3_i32 = arith.constant 3 : i32
      %18 = arith.cmpi eq, %8, %c3_i32 : i32
      %19 = arith.extui %18 : i1 to i32
      %c0_i32_9 = arith.constant 0 : i32
      %20 = arith.cmpi ne, %19, %c0_i32_9 : i32
      scf.if %20 {
        %c0_12 = arith.constant 0 : index
        %c0_13 = arith.constant 0 : index
        %c0_14 = arith.constant 0 : index
        %24 = vector.load %arg6[%c0_12, %c0_13, %c0_14] : memref<1x16x16xf32, #tpu.memory_space<vmem>>, vector<1x16x16xf32>
        %25 = vector.shape_cast %24 : vector<1x16x16xf32> to vector<16x16xf32>
        %26 = vector.broadcast %11 : f32 to vector<16x16xf32>
        %27 = arith.mulf %25, %26 : vector<16x16xf32>
        %c0_15 = arith.constant 0 : index
        %c0_16 = arith.constant 0 : index
        %c0_17 = arith.constant 0 : index
        %28 = vector.load %arg6[%c0_15, %c0_16, %c0_17] : memref<1x16x16xf32, #tpu.memory_space<vmem>>, vector<1x16x16xf32>
        %29 = vector.shape_cast %28 : vector<1x16x16xf32> to vector<16x16xf32>
        %30 = vector.shape_cast %27 : vector<16x16xf32> to vector<1x16x16xf32>
        tpu.vector_store %arg6[%c0_15, %c0_16, %c0_17], %30 {strides = array<i32>} : memref<1x16x16xf32, #tpu.memory_space<vmem>>, vector<1x16x16xf32>,
      } else {
      }
      %c4_i32_10 = arith.constant 4 : i32
      %21 = arith.cmpi eq, %8, %c4_i32_10 : i32
      %22 = arith.extui %21 : i1 to i32
      %c0_i32_11 = arith.constant 0 : i32
      %23 = arith.cmpi ne, %22, %c0_i32_11 : i32
      scf.if %23 {
        %c0_12 = arith.constant 0 : index
        %c0_13 = arith.constant 0 : index
        %c0_14 = arith.constant 0 : index
        %24 = vector.load %arg6[%c0_12, %c0_13, %c0_14] : memref<1x16x16xf32, #tpu.memory_space<vmem>>, vector<1x16x16xf32>
        %25 = vector.shape_cast %24 : vector<1x16x16xf32> to vector<16x16xf32>
        %26 = vector.shape_cast %25 : vector<16x16xf32> to vector<1x16x16xf32>
        %cst = arith.constant dense<0.000000e+00> : vector<1xf32>
        %27 = vector.multi_reduction <add>, %26, %cst [1, 2] : vector<1x16x16xf32> to vector<1xf32>
        %28 = vector.shape_cast %27 : vector<1xf32> to vector<1x1x1xf32>
        %29 = vector.extract %28[0, 0, 0] : f32 from vector<1x1x1xf32>
        %cst_15 = arith.constant 2.560000e+02 : f32
        %30 = arith.divf %29, %cst_15 : f32
        %31 = vector.shape_cast %25 : vector<16x16xf32> to vector<1x16x16xf32>
        %cst_16 = arith.constant dense<0x7F800000> : vector<1xf32>
        %32 = vector.multi_reduction <minimumf>, %31, %cst_16 [1, 2] : vector<1x16x16xf32> to vector<1xf32>
        %33 = vector.shape_cast %32 : vector<1xf32> to vector<1x1x1xf32>
        %34 = vector.extract %33[0, 0, 0] : f32 from vector<1x1x1xf32>
        %35 = vector.shape_cast %25 : vector<16x16xf32> to vector<1x16x16xf32>
        %cst_17 = arith.constant dense<0xFF800000> : vector<1xf32>
        %36 = vector.multi_reduction <maximumf>, %35, %cst_17 [1, 2] : vector<1x16x16xf32> to vector<1xf32>
        %37 = vector.shape_cast %36 : vector<1xf32> to vector<1x1x1xf32>
        %38 = vector.extract %37[0, 0, 0] : f32 from vector<1x1x1xf32>
        %39 = vector.broadcast %30 : f32 to vector<16x16xf32>
        %40 = arith.subf %25, %39 : vector<16x16xf32>
        %41 = vector.broadcast %11 : f32 to vector<16x16xf32>
        %42 = arith.mulf %40, %41 : vector<16x16xf32>
        %43 = vector.broadcast %30 : f32 to vector<16x16xf32>
        %44 = arith.addf %42, %43 : vector<16x16xf32>
        %45 = vector.broadcast %34 : f32 to vector<16x16xf32>
        %46 = arith.maximumf %45, %44 : vector<16x16xf32>
        %47 = vector.broadcast %38 : f32 to vector<16x16xf32>
        %48 = arith.minimumf %47, %46 : vector<16x16xf32>
        %c0_18 = arith.constant 0 : index
        %c0_19 = arith.constant 0 : index
        %c0_20 = arith.constant 0 : index
        %49 = vector.load %arg6[%c0_18, %c0_19, %c0_20] : memref<1x16x16xf32, #tpu.memory_space<vmem>>, vector<1x16x16xf32>
        %50 = vector.shape_cast %49 : vector<1x16x16xf32> to vector<16x16xf32>
        %51 = vector.shape_cast %48 : vector<16x16xf32> to vector<1x16x16xf32>
        tpu.vector_store %arg6[%c0_18, %c0_19, %c0_20], %51 {strides = array<i32>} : memref<1x16x16xf32, #tpu.memory_space<vmem>>, vector<1x16x16xf32>,
      } else {
      }
    }
    %c4_i32_5 = arith.constant 4 : i32
    return
  }
  func.func @transform_0(%arg0: i32) -> (i32, i32) {
    %c0_i32 = arith.constant 0 : i32
    %c0_i32_0 = arith.constant 0 : i32
    %c0_i32_1 = arith.constant 0 : i32
    return %c0_i32, %c0_i32_0 : i32, i32
  }
  func.func @transform_1(%arg0: i32) -> (i32, i32) {
    %c0_i32 = arith.constant 0 : i32
    %c0_i32_0 = arith.constant 0 : i32
    %c0_i32_1 = arith.constant 0 : i32
    return %c0_i32, %c0_i32_0 : i32, i32
  }
  func.func @transform_2(%arg0: i32) -> (i32, i32) {
    %c0_i32 = arith.constant 0 : i32
    %c0_i32_0 = arith.constant 0 : i32
    %c0_i32_1 = arith.constant 0 : i32
    return %c0_i32, %c0_i32_0 : i32, i32
  }
  func.func @transform_3(%arg0: i32) -> (i32, i32, i32) {
    %c0_i32 = arith.constant 0 : i32
    %c0_i32_0 = arith.constant 0 : i32
    %c0_i32_1 = arith.constant 0 : i32
    return %arg0, %c0_i32, %c0_i32_0 : i32, i32, i32
  }
  func.func @transform_4(%arg0: i32) -> (i32, i32, i32) {
    %c0_i32 = arith.constant 0 : i32
    %c0_i32_0 = arith.constant 0 : i32
    %c0_i32_1 = arith.constant 0 : i32
    return %arg0, %c0_i32, %c0_i32_0 : i32, i32, i32
  }
  func.func @transform_5(%arg0: i32) -> (i32, i32, i32) {
    %c0_i32 = arith.constant 0 : i32
    %c0_i32_0 = arith.constant 0 : i32
    %c0_i32_1 = arith.constant 0 : i32
    return %arg0, %c0_i32, %c0_i32_0 : i32, i32, i32
  }
}

</mosaic_0001>

<bundles_post_ra>
// kernel: tpu_custom_call.1
= control target key start
LH: loop header
LB: loop body
LE: loop exit
PB: predicated region body
PF: predicated region fallthrough
CT: control target
= control target key end

     0   :  { %s1357_s0 = inlined_call_operand.vmem [shape: s32[2,4], index: 0, kind: input, shape index: {}]   ;;  %s1358_s1 = inlined_call_operand.vmem [shape: f32[2,4], index: 1, kind: input, shape index: {}]   ;;  %s1359_s2 = inlined_call_operand.vmem [shape: f32[2,11], index: 2, kind: input, shape index: {}]   ;;  %s1360_s3 = inlined_call_operand.vmem [shape: f32[2,16,16], index: 3, kind: input, shape index: {}]   ;;  %s1361_s4 = inlined_call_operand.hbm [shape: f32[2,16,16], index: 4, kind: input, shape index: {}, may-alias: {4,5}]   ;;  %s1362_s5 = inlined_call_operand.hbm [shape: f32[2,16,16], index: 5, kind: output, shape index: {}, may-alias: {4,5}]  }
   0x1   :  { %1363 = sst [smem:[#allocation15_spill]] %s1357_s0 }
   0x2   :  { %1364 = sst [smem:[#allocation16_spill]] %s1358_s1 }
   0x3   :  { %1365 = sst [smem:[#allocation17_spill]] %s1359_s2 }
   0x4   :  { %10 = vsyncpa [#allocation5], 0 }
   0x5   :  { %11 = vsyncpa [#allocation7], 0 }
   0x6   :  { %12 = vsyncpa [#allocation3], 0 }
   0x7   :  { %14 = vsyncpa [#allocation3 + $0x1], 0 }
   0x8   :  { %15 = vsyncpa [#allocation4], 0 }
   0x9   :  { %17 = vsyncpa [#allocation4 + $0x1], 0  ;;  %s1062_s18 = smov 0   ;;  %s1064_s19 = smov 0  }
   0xa   :  { %s1066_s20 = smov 0   ;;  %s1068_s21 = smov 0  }
   0xb LB: > { %s1083_s22 = sadd.s32 4294967295, %s1018_s21   ;;  %s726_s23 = sadd.s32 4294967294, %s1018_s21   ;;  %s1018_s21 = sphi %s1068_s21, %s1378_s21   ;;  %s1014_s20 = sphi %s1066_s20, %s1377_s20   ;;  %s1010_s19 = sphi %s1064_s19, %s1376_s19   ;;  %s1006_s18 = sphi %s1062_s18, %s1375_s18  }
   0xc   : > { %p132_p0 = scmp.ne.s32.totalorder %s1010_s19, %s1006_s18  ;;  %p133_p1 = scmp.eq.s32.totalorder %s1083_s22, 0 }
   0xd   : > { %p156_p2 = scmp.eq.s32.totalorder %s1083_s22, 1  ;;  %p162_p3 = scmp.eq.s32.totalorder %s726_s23, 1 }
   0xe   : > { %p1092_p4 = por %p133_p1, %p132_p0  ;;  %p727_p5 = scmp.ge.s32.totalorder %s1018_s21, 1 }
   0xf   : > { %p1097_p6 = por %p162_p3, %p132_p0  ;;  %p169_p7 = scmp.lt.s32.totalorder %s1018_s21, 3 }
  0x10   : > { %s1368_s1 = sld [smem:[#allocation16_spill]]  ;;  %s1024_s11 = smov [#allocation6]  }
  0x11   : > { %p1105_p8 = pnand %p727_p5, %p169_p7  ;;  %s1370_s0 = sld [smem:[#allocation15_spill]] }
  0x12   : > { %s1371_s2 = sld [smem:[#allocation17_spill]]  ;;  %s1025_s12 = smov [#allocation2]  }
  0x13   : > { %p789_p10 = pneg %p1105_p8  ;;  %s1026_s13 = smov [#allocation8]  }
  0x14   : > { %s1121_s14 = sadd.s32 1, %s1018_s21   ;;  %s119_s16 = sadd.s32 1, %s1014_s20 }
  0x15   : > { %p790_p11 = pnand %p789_p10, %p133_p1  ;;  %s116_s15 = ssub.s32 %s1018_s21, %s1121_s14 }
  0x16   : > { %s191_s28 = sshll.u32 %s1368_s1, 4  ;;  %p117_p12 = scmp.eq.s32.totalorder %s116_s15, 0  ;;  %s192_s28 = int_to_ptr.vmem [resolvable:$true] %s191_s28 }
  0x17   : > { %s181_s7 = sshll.u32 %s1370_s0, 4  ;;  %p126_p13 = scmp.ne.s32.totalorder %s1014_s20, %s1010_s19  ;;  %s182_s7 = int_to_ptr.vmem [resolvable:$true] %s181_s7 }
  0x18   : > { %s201_s10 = sshll.u32 %s1371_s2, 4  ;;  %p127_p0 = scmp.eq.s32.totalorder %s1018_s21, 0  ;;  %s202_s10 = int_to_ptr.vmem [resolvable:$true] %s201_s10 }
  0x19   : > { %795 = dma.vmem_to_smem (!%p790_p11), %s192_s28, 32, %s1024_s11, [#allocation7]  }
  0x1a   : > { %792 = dma.vmem_to_smem (!%p790_p11), %s182_s7, 32, %s1025_s12, [#allocation5]  }
  0x1b   : > { %798 = dma.vmem_to_smem (!%p790_p11), %s202_s10, 32, %s1026_s13, [#allocation7]  }
  0x1c   : > { %p810_p3 = scmp.lt.s32.totalorder %s1018_s21, 2  ;;  %p128_p5 = por %p127_p0, %p126_p13 }
  0x1d   : > { %s1131_s17 = scalar_select %p117_p12, %s1014_s20, %s119_s16  }
  0x1e   : > { %p1135_p7 = por %p156_p2, %p126_p13  ;;  %s220_s26 = sand.u32 1, %s1014_s20  }
  0x1f   : > { %s758_s27 = sshll.u32 %s1018_s21, 4  ;;  %s732_s28 = sshll.u32 %s220_s26, 4 }
  0x20   : > { %s229_s7 = scalar_lea.hbm %s1361_s4, %s758_s27  ;;  %s224_s9 = scalar_lea.vmem [#allocation9], %s732_s28 }
  0x21   : > { %s230_s8 = sshll.u32 %s229_s7, 4  ;;  %s232_s10 = sshll.u32 %s224_s9, 4  ;;  %s231_s8 = int_to_ptr.hbm [resolvable:$true] %s230_s8  ;;  %s233_s10 = int_to_ptr.vmem [resolvable:$true] %s232_s10 }
  0x22   : > { %p1146_p10 = pnand %p810_p3, %p128_p5  ;;  %s221_s12 = scalar_lea.sflag [#allocation3], %s220_s26 }
  0x23   : > { %s910_s13 = sshra.s32 %s231_s8, 4  ;;  %s917_s28 = scalar_lea.hbm %s1361_s4, 32  ;;  %s911_s13 = int_to_ptr.hbm [resolvable:$true] %s910_s13 }
  0x24   : > { %s912_s15 = scalar_lea.hbm %s911_s13, 16  ;;  %p914_p11 = pneg %p1146_p10 }
  0x25   : > { %p913_p2 = scmp.ne.s32.totalorder %s911_s13, %s912_s15  ;;  %p918_p0 = scmp.lt.s32.totalorder %s911_s13, %s1361_s4 }
  0x26   : > { %p919_p3 = scmp.lt.s32.totalorder %s917_s28, %s912_s15 }
  0x27   : > { %p915_p12 = pnand %p914_p11, %p913_p2 }
  0x28   : > { %p920_p5 = por %p919_p3, %p918_p0 }
  0x29   : > { %p916_p13 = pneg %p915_p12 }
  0x2b   : > { %p921_p9 = pnand %p920_p5, %p916_p13 }
  0x2d   : > { %924 = shalt.err (!%p921_p9)
}
  0x2e   : > { %s1027_s26 = smov 128   ;;  %s1028_s7 = smov 8  }
  0x2f   : > { %802 = dma.hbm_to_vmem [thread:$0]  (!%p1146_p10), %s231_s8, 256, %s233_s10, %s221_s12, %s1027_s26, %s1027_s26, %s1028_s7  }
  0x30   : > { %244 = sbr.rel (%p1105_p8) target bundleno = 630 (0x276), region = 40 }
  0x35   : > { %989 = dma.done.wait (%p133_p1), [#allocation5], 32  }
  0x36   : > { %991 = vsyncadd (%p133_p1), [#allocation5], 4294967264 }
  0x37   : > { %993 = dma.done.wait (%p133_p1), [#allocation7], 64  }
  0x38   : > { %995 = vsyncadd (%p133_p1), [#allocation7], 4294967232  ;;  %s1171_s9 = sand.u32 1, %s1010_s19  }
  0x39   : > { %s739_s29 = sshll.u32 %s1171_s9, 4  ;;  %s262_s8 = scalar_lea.sflag [#allocation3], %s1171_s9 }
  0x3a   : > { %s265_s10 = scalar_lea.vmem [#allocation9], %s739_s29 }
  0x3b   : > { %997 = dma.done.wait (%p1092_p4), %s262_s8, 256  }
  0x3c   : > { %999 = vsyncadd (%p1092_p4), %s262_s8, 4294967040 }
  0x3d   : > { %271 = sfence }
  0x3e   : > { %p299_p8 = scmp.lt.s32.totalorder %s1083_s22, 1  ;;  %v304_v0 = vld [vmem:[%s265_s10] sm:$0xff]  ;;  %vm306_vm0 = vcmask 130048   ;;  %v305_v1 = vld [vmem:[%s265_s10 + $0x8] sm:$0xff]  ;;  %s1180_s11 = scalar_lea.vmem [#allocation10], %s739_s29 }
  0x3f   : > { %307 = vst.msk [vmem:[%s1180_s11] sm:$0xff] %vm306_vm0, %v304_v0  ;;  %s1192_s27 = smov 0  }
  0x40   : > { %s300_s12 = scalar_select %p299_p8, %s1083_s22, 1  ;;  %308 = vst.msk [vmem:[%s1180_s11 + $0x8] sm:$0xff] %vm306_vm0, %v305_v1 }
  0x42   : > { %s759_s13 = sshll.u32 %s300_s12, 4 }
  0x43   : > { %s1190_s16 = scalar_lea.vmem %s1360_s3, %s759_s13 }
  0x44 LB: >> { %s315_s28 = sshra.s32 %s1022_s27, 7  ;;  %s320_s30 = sand.u32 127, %s1022_s27  ;;  %s1022_s27 = sphi %s1192_s27, %s314_s27  }
  0x45   : >> { %s317_s6 = sadd.s32 %s1083_s22, %s315_s28 }
  0x46   : >> { %s743_s26 = sshll.u32 %s317_s6, 7 }
  0x47   : >> { %s321_s7 = sadd.s32 %s743_s26, %s320_s30 }
  0x48   : >> { %s1200_s29 = sld [smem:[#allocation2 + %s321_s7]] }
  0x49   : >> { %s1202_s8 = sld [smem:[#allocation6 + %s321_s7]] }
  0x4e   : >> { %p744_p1 = scmp.ne.s32.totalorder %s1200_s29, 1 }
  0x50   : >> { %327 = sbr.rel (%p744_p1) target bundleno = 93 (0x5d), region = 67 }
  0x55   : >> { %v328_v2 = vld [vmem:[%s1180_s11] sm:$0xff]  ;;  %v332_v4 = vstv %s1202_s8  ;;  %v329_v6 = vld [vmem:[%s1180_s11 + $0x8] sm:$0xff] }
  0x56   : >> { %v330_v3 = vld [vmem:[%s1190_s16] sm:$0xff]  ;;  %v331_v7 = vld [vmem:[%s1190_s16 + $0x8] sm:$0xff] }
  0x57   : >> { %v333_v5 = vmul.f32 %v332_v4, %v330_v3  ;;  %v334_v8 = vmul.f32 %v332_v4, %v331_v7 }
  0x59   : >> { %v335_v9 = vadd.f32 %v333_v5, %v328_v2  ;;  %v336_v10 = vadd.f32 %v334_v8, %v329_v6 }
  0x5b   : >> { %337 = vst.msk [vmem:[%s1180_s11] sm:$0xff] %vm306_vm0, %v335_v9 }
  0x5c   : >> { %338 = vst.msk [vmem:[%s1180_s11 + $0x8] sm:$0xff] %vm306_vm0, %v336_v10 }
  0x5d PF: >> { %p745_p4 = scmp.ne.s32.totalorder %s1200_s29, 2 }
  0x5e   : >> { %s1218_s10 = sshll.u32 (!%p745_p4), %s1083_s22, 7 }
  0x5f   : >> { %342 = sbr.rel (%p745_p4) target bundleno = 395 (0x18b), region = 71  ;;  %s1221_s12 = sld [smem:[#allocation8 + %s1218_s10]] (!%p745_p4) }
  0x60   : >> { %s363_s13 = sadd.s32 (!%p745_p4), 1, %s1218_s10  ;;  %s372_s24 = sadd.s32 (!%p745_p4), 2, %s1218_s10 }
  0x61   : >> { %s1224_s15 = sld [smem:[#allocation8 + %s363_s13]] (!%p745_p4)  ;;  %s381_s30 = sadd.s32 (!%p745_p4), 3, %s1218_s10 }
  0x62   : >> { %s1227_s28 = sld [smem:[#allocation8 + %s372_s24]] (!%p745_p4)  ;;  %s390_s26 = sadd.s32 (!%p745_p4), 4, %s1218_s10 }
  0x63   : >> { %s1230_s6 = sld [smem:[#allocation8 + %s381_s30]] (!%p745_p4)  ;;  %s399_s0 = sadd.s32 (!%p745_p4), 5, %s1218_s10 }
  0x64   : >> { %v344_v11 = vld [vmem:[%s1180_s11 + $0x8] sm:$0xff]  ;;  %v343_v12 = vld [vmem:[%s1180_s11] sm:$0xff]  ;;  %v345_v13 = vlaneseq  ;;  %s1233_s7 = sld [smem:[#allocation8 + %s390_s26]]  ;;  %s408_s1 = sadd.s32 6, %s1218_s10 }
  0x65   : >> { %761 = vmatpush.msra.mxu2 %v344_v11  ;;  %471 = vmatpush.msra.mxu0 %v344_v11  ;;  %s1238_s13 = sld [smem:[#allocation8 + %s399_s0]]  ;;  %v356_v18 = vstv %s1221_s12  ;;  %s417_s2 = sadd.s32 7, %s1218_s10 }
  0x66   : >> { %v346_v14 = vshrl.u32 %v345_v13, 7  ;;  %v349_v15 = vand.u32 127, %v345_v13  ;;  %s1242_s24 = sld [smem:[#allocation8 + %s408_s1]]  ;;  %s426_s30 = sadd.s32 8, %s1218_s10 }
  0x67   : >> { %762 = vmatpush.msra.mxu2 %v343_v12  ;;  %472 = vmatpush.msra.mxu0 %v343_v12  ;;  %v365_v20 = vstv %s1224_s15  ;;  %s1251_s0 = sld [smem:[#allocation8 + %s417_s2]]  ;;  %s435_s1 = sadd.s32 9, %s1218_s10 }
  0x68   : >> { %v347_v16 = vadd.s32 8, %v346_v14  ;;  %v1245_v19 = vsub.s32 %v349_v15, %v346_v14  ;;  %v374_v23 = vstv %s1227_s28  ;;  %s1259_s12 = sld [smem:[#allocation8 + %s426_s30]]  ;;  %s444_s2 = sadd.s32 10, %s1218_s10 }
  0x69   : >> { %v383_v26 = vstv %s1230_s6  ;;  %s1266_s15 = sld [smem:[#allocation8 + %s435_s1]] }
  0x6a   : >> { %v1236_v17 = vsub.s32 %v349_v15, %v347_v16  ;;  %v392_v28 = vstv %s1233_s7  ;;  %vm352_vm6 = vcmp.eq.s32.totalorder %v1245_v19, 4294967291  ;;  %vm361_vm8 = vcmp.eq.s32.totalorder %v1245_v19, 4294967292  ;;  %s1272_s28 = sld [smem:[#allocation8 + %s444_s2]] }
  0x6b   : >> { %v401_v30 = vstv %s1238_s13  ;;  %vm370_vm9 = vcmp.eq.s32.totalorder %v1245_v19, 4294967293  ;;  %vm379_vm11 = vcmp.eq.s32.totalorder %v1245_v19, 4294967294  ;;  %v357_v35 = vsel %vm352_vm6, %v356_v18, 0.0 }
  0x6c   : >> { %vm353_vm1 = vcmp.eq.s32.totalorder %v1236_v17, 4294967291  ;;  %vm362_vm2 = vcmp.eq.s32.totalorder %v1236_v17, 4294967292  ;;  %vm371_vm3 = vcmp.eq.s32.totalorder %v1236_v17, 4294967293  ;;  %vm380_vm4 = vcmp.eq.s32.totalorder %v1236_v17, 4294967294 }
  0x6d   : >> { %v358_v21 = vsel %vm353_vm1, %v356_v18, 0.0  ;;  %v367_v22 = vsel %vm362_vm2, %v365_v20, 0.0  ;;  %v376_v25 = vsel %vm371_vm3, %v374_v23, 0.0  ;;  %vm389_vm5 = vcmp.eq.s32.totalorder %v1236_v17, 4294967295 }
  0x6e   : >> { %v369_v24 = vadd.f32 %v367_v22, %v358_v21  ;;  %v385_v27 = vsel %vm380_vm4, %v383_v26, 0.0  ;;  %vm398_vm7 = vcmp.eq.s32.totalorder %v1236_v17, 0  ;;  %v394_v31 = vsel %vm389_vm5, %v392_v28, 0.0 }
  0x6f   : >> { %vm407_vm10 = vcmp.eq.s32.totalorder %v1236_v17, 1  ;;  %v410_v33 = vstv %s1242_s24  ;;  %v403_v34 = vsel %vm398_vm7, %v401_v30, 0.0  ;;  %v366_v36 = vsel %vm361_vm8, %v365_v20, 0.0 }
  0x70   : >> { %v378_v29 = vadd.f32 %v376_v25, %v369_v24  ;;  %vm388_vm12 = vcmp.eq.s32.totalorder %v1245_v19, 4294967295  ;;  %vm416_vm13 = vcmp.eq.s32.totalorder %v1236_v17, 2  ;;  %v419_v38 = vstv %s1251_s0 }
  0x71   : >> { %v368_v39 = vadd.f32 %v366_v36, %v357_v35  ;;  %v412_v40 = vsel %vm407_vm10, %v410_v33, 0.0  ;;  %v375_v41 = vsel %vm370_vm9, %v374_v23, 0.0  ;;  %v384_v42 = vsel %vm379_vm11, %v383_v26, 0.0 }
  0x72   : >> { %v387_v32 = vadd.f32 %v385_v27, %v378_v29  ;;  %vm397_vm14 = vcmp.eq.s32.totalorder %v1245_v19, 0  ;;  %vm425_vm15 = vcmp.eq.s32.totalorder %v1236_v17, 3  ;;  %v428_v44 = vstv %s1259_s12 }
  0x73   : >> { %v377_v45 = vadd.f32 %v375_v41, %v368_v39  ;;  %v421_v46 = vsel %vm416_vm13, %v419_v38, 0.0  ;;  %vm434_vm1 = vcmp.eq.s32.totalorder %v1236_v17, 4  ;;  %v393_v47 = vsel %vm388_vm12, %v392_v28, 0.0 }
  0x74   : >> { %v396_v37 = vadd.f32 %v394_v31, %v387_v32  ;;  %v437_v49 = vstv %s1266_s15  ;;  %vm406_vm2 = vcmp.eq.s32.totalorder %v1245_v19, 1  ;;  %v430_v51 = vsel %vm425_vm15, %v428_v44, 0.0 }
  0x75   : >> { %v386_v50 = vadd.f32 %v384_v42, %v377_v45  ;;  %vm443_vm3 = vcmp.eq.s32.totalorder %v1236_v17, 5  ;;  %v402_v52 = vsel %vm397_vm14, %v401_v30, 0.0  ;;  %v446_v54 = vstv %s1272_s28 }
  0x76   : >> { %v405_v43 = vadd.f32 %v403_v34, %v396_v37  ;;  %vm415_vm4 = vcmp.eq.s32.totalorder %v1245_v19, 2  ;;  %v439_v56 = vsel %vm434_vm1, %v437_v49, 0.0  ;;  %v411_v57 = vsel %vm406_vm2, %v410_v33, 0.0 }
  0x77   : >> { %v395_v55 = vadd.f32 %v393_v47, %v386_v50  ;;  %vm424_vm5 = vcmp.eq.s32.totalorder %v1245_v19, 3  ;;  %v448_v60 = vsel %vm443_vm3, %v446_v54, 0.0  ;;  %v420_v61 = vsel %vm415_vm4, %v419_v38, 0.0 }
  0x78   : >> { %v414_v48 = vadd.f32 %v412_v40, %v405_v43  ;;  %vm433_vm6 = vcmp.eq.s32.totalorder %v1245_v19, 4  ;;  %v429_v0 = vsel %vm424_vm5, %v428_v44, 0.0  ;;  %vm442_vm7 = vcmp.eq.s32.totalorder %v1245_v19, 5 }
  0x79   : >> { %v404_v59 = vadd.f32 %v402_v52, %v395_v55  ;;  %v438_v3 = vsel %vm433_vm6, %v437_v49, 0.0  ;;  %v447_v5 = vsel %vm442_vm7, %v446_v54, 0.0 }
  0x7a   : >> { %v423_v53 = vadd.f32 %v421_v46, %v414_v48 }
  0x7b   : >> { %v413_v63 = vadd.f32 %v411_v57, %v404_v59 }
  0x7c   : >> { %v432_v58 = vadd.f32 %v430_v51, %v423_v53 }
  0x7d   : >> { %v422_v2 = vadd.f32 %v420_v61, %v413_v63 }
  0x7e   : >> { %v441_v62 = vadd.f32 %v439_v56, %v432_v58 }
  0x7f   : >> { %v431_v4 = vadd.f32 %v429_v0, %v422_v2 }
  0x80   : >> { %v450_v1 = vadd.f32 %v448_v60, %v441_v62 }
  0x81   : >> { %v440_v6 = vadd.f32 %v438_v3, %v431_v4 }
  0x82   : >> { %748 = vmatmul.msk.f32.vlgmr.msra.gmra.mxu2 %vm306_vm0, %v450_v1  ;;  %763 = vmatpush.msra.mxu3 %v450_v1 }
  0x83   : >> { %500 = vmatpush.msra.mxu1 %v450_v1  ;;  %v449_v7 = vadd.f32 %v447_v5, %v440_v6 }
  0x85   : >> { %747 = vmatmul.msk.f32.vlgmr.msra.gmra.mxu0 %vm306_vm0, %v449_v7  ;;  %764 = vmatpush.msra.mxu3 %v449_v7 }
  0x86   : >> { %501 = vmatpush.msra.mxu1 %v449_v7 }
 0x102   : >> { %v474_v9 = vpop.f32.mrf.mxu0 }
 0x103   : >> { %749 = vmatmul.msk.f32.vlgmr.msra.gmra.mxu1 %vm306_vm0, %v474_v9 }
 0x105   : >> { %v477_v8 = vpop.f32.mrf.mxu2 }
 0x106   : >> { %750 = vmatmul.msk.f32.vlgmr.msra.gmra.mxu3 %vm306_vm0, %v477_v8 }
 0x180   : >> { %v503_v10 = vpop.f32.mrf.mxu1 }
 0x181   : >> { %509 = vst.msk [vmem:[%s1180_s11] sm:$0xff] %vm306_vm0, %v503_v10 }
 0x189   : >> { %v506_v11 = vpop.f32.mrf.mxu3 }
 0x18a   : >> { %510 = vst.msk [vmem:[%s1180_s11 + $0x8] sm:$0xff] %vm306_vm0, %v506_v11 }
 0x18b PF: >> { %p751_p9 = scmp.ne.s32.totalorder %s1200_s29, 3 }
 0x18d   : >> { %514 = sbr.rel (%p751_p9) target bundleno = 407 (0x197), region = 75 }
 0x192   : >> { %v515_v12 = vld [vmem:[%s1180_s11] sm:$0xff]  ;;  %v517_v13 = vstv %s1202_s8  ;;  %v516_v14 = vld [vmem:[%s1180_s11 + $0x8] sm:$0xff] }
 0x193   : >> { %v518_v15 = vmul.f32 %v517_v13, %v515_v12  ;;  %v519_v16 = vmul.f32 %v517_v13, %v516_v14 }
 0x195   : >> { %520 = vst.msk [vmem:[%s1180_s11] sm:$0xff] %vm306_vm0, %v518_v15 }
 0x196   : >> { %521 = vst.msk [vmem:[%s1180_s11 + $0x8] sm:$0xff] %vm306_vm0, %v519_v16 }
 0x197 PF: >> { %p752_p10 = scmp.ne.s32.totalorder %s1200_s29, 4 }
 0x199   : >> { %525 = sbr.rel (%p752_p10) target bundleno = 612 (0x264), region = 79 }
 0x19e   : >> { %v526_v17 = vld [vmem:[%s1180_s11] sm:$0xff]  ;;  %v527_v18 = vld [vmem:[%s1180_s11 + $0x8] sm:$0xff]  ;;  %v1029_v28 = vmov 256.0   ;;  %v576_v57 = vstv %s1202_s8 }
 0x19f   : >> { %v528_v19 = vsel %vm306_vm0, %v526_v17, 0.0  ;;  %v529_v20 = vsel %vm306_vm0, %v527_v18, 0.0  ;;  %v561_v21 = vsel %vm306_vm0, %v526_v17, -inf  ;;  %v562_v22 = vsel %vm306_vm0, %v527_v18, -inf }
 0x1a0   : >> { %v530_v23 = vadd.f32 %v529_v20, %v528_v19  ;;  %v563_v24 = vmax.f32 %v561_v21, %v562_v22  ;;  %v549_v25 = vsel %vm306_vm0, %v526_v17, inf  ;;  %v550_v26 = vsel %vm306_vm0, %v527_v18, inf }
 0x1a1   : >> { %v551_v27 = vmin.f32 %v549_v25, %v550_v26  ;;  %863 = vrcp.f32 %v1029_v28 }
 0x1a2   : >> { %531 = vadd.xlane.f32.xlu0 %v530_v23  ;;  %564 = vmax.xlane.f32.xlu1 %v563_v24 }
 0x1a7   : >> { %v864_v29 = vpop.eup %863 }
 0x1a8   : >> { %v541_v30 = vmul.f32 256.0, %v864_v29  ;;  %vm545_vm8 = vweird.f32 %v864_v29 }
 0x1aa   : >> { %552 = vmin.xlane.f32.xlu0 %v551_v27  ;;  %v542_v31 = vsub.f32 1.0, %v541_v30 }
 0x1ac   : >> { %v543_v37 = vmul.f32 %v864_v29, %v542_v31 }
 0x1ae   : >> { %v544_v41 = vadd.f32 %v864_v29, %v543_v37 }
 0x1b0   : >> { %v546_v48 = vsel %vm545_vm8, %v864_v29, %v544_v41 }
 0x215   : >> { %v532_v32 = vpop.xlane.xlu0 %531  ;;  %v565_v33 = vpop.xlane.xlu1 %564 }
 0x216   : >> { %v533_v34 = vrot.slane %v532_v32, 4  ;;  %v566_v35 = vrot.slane %v565_v33, 4 }
 0x218   : >> { %v534_v36 = vadd.f32 %v533_v34, %v532_v32  ;;  %v567_v38 = vmax.f32 %v565_v33, %v566_v35 }
 0x21a   : >> { %v535_v39 = vrot.slane %v534_v36, 2  ;;  %v568_v42 = vrot.slane %v567_v38, 2 }
 0x21c   : >> { %v536_v40 = vadd.f32 %v535_v39, %v534_v36  ;;  %v569_v49 = vmax.f32 %v567_v38, %v568_v42 }
 0x21d   : >> { %v553_v43 = vpop.xlane.xlu0 %552 }
 0x21e   : >> { %v554_v44 = vrot.slane %v553_v43, 4  ;;  %v537_v45 = vrot.slane %v536_v40, 1  ;;  %v570_v52 = vrot.slane %v569_v49, 1 }
 0x220   : >> { %v555_v46 = vmin.f32 %v553_v43, %v554_v44  ;;  %v538_v47 = vadd.f32 %v537_v45, %v536_v40  ;;  %v571_v55 = vmax.f32 %v569_v49, %v570_v52 }
 0x222   : >> { %v556_v50 = vrot.slane %v555_v46, 2  ;;  %765 = vpush %v538_v47 }
 0x223   : >> { %767 = vpush %v546_v48 }
 0x224   : >> { %v557_v51 = vmin.f32 %v555_v46, %v556_v50 }
 0x226   : >> { %v558_v53 = vrot.slane %v557_v51, 1 }
 0x228   : >> { %v559_v54 = vmin.f32 %v557_v51, %v558_v53 }
 0x22a   : >> { %769 = vpush %v559_v54 }
 0x22b   : >> { %771 = vpush %v571_v55 }
 0x253   : >> { %s766_s29 = spop %765 }
 0x254   : >> { %s768_s10 = spop %767 }
 0x255   : >> { %s548_s6 = smul.f32 %s768_s10, %s766_s29 }
 0x257   : >> { %v573_v56 = vstv %s548_s6 }
 0x258   : >> { %v574_v58 = vsub.f32 %v526_v17, %v573_v56  ;;  %v575_v59 = vsub.f32 %v527_v18, %v573_v56 }
 0x25a   : >> { %v577_v60 = vmul.f32 %v576_v57, %v574_v58  ;;  %v578_v61 = vmul.f32 %v576_v57, %v575_v59 }
 0x25b   : >> { %s770_s26 = spop %769 }
 0x25c   : >> { %v579_v62 = vadd.f32 %v577_v60, %v573_v56  ;;  %v580_v63 = vadd.f32 %v578_v61, %v573_v56  ;;  %v581_v0 = vstv %s770_s26  ;;  %s772_s7 = spop %771 }
 0x25d   : >> { %v584_v3 = vstv %s772_s7 }
 0x25e   : >> { %v582_v1 = vmax.f32 %v581_v0, %v579_v62  ;;  %v583_v2 = vmax.f32 %v581_v0, %v580_v63 }
 0x260   : >> { %v585_v4 = vmin.f32 %v584_v3, %v582_v1  ;;  %v586_v5 = vmin.f32 %v584_v3, %v583_v2 }
 0x262   : >> { %587 = vst.msk [vmem:[%s1180_s11] sm:$0xff] %vm306_vm0, %v585_v4 }
 0x263   : >> { %588 = vst.msk [vmem:[%s1180_s11 + $0x8] sm:$0xff] %vm306_vm0, %v586_v5 }
 0x264 PF: >> { %s314_s27 = sadd.s32 1, %s1022_s27  }
 0x265   : >> { %p311_p2 = scmp.ge.s32.totalorder %s314_s27, 4  }
 0x266   : > { %s760_s8 = sshll.u32 (%p311_p2), %s1083_s22, 4  ;;  %s602_s30 = sshll.u32 (%p311_p2), %s1180_s11, 4  ;;  %s603_s30 = int_to_ptr.vmem [resolvable:$true] %s602_s30 }
 0x267   : > { %313 = sbr.rel (!%p311_p2) target bundleno = 68 (0x44), region = 124  ;;  %s601_s0 = scalar_lea.hbm (%p311_p2), %s1362_s5, %s760_s8 }
 0x268   : > { %s604_s1 = sshll.u32 (%p311_p2), %s601_s0, 4  ;;  %s590_s12 = scalar_lea.sflag (%p311_p2), [#allocation4], %s1171_s9  ;;  %s605_s1 = int_to_ptr.hbm [resolvable:$true] %s604_s1 }
 0x269   : > { %s954_s2 = sshra.s32 (%p311_p2), %s605_s1, 4  ;;  %s960_s22 = scalar_lea.hbm (%p311_p2), %s1362_s5, 32  ;;  %s955_s2 = int_to_ptr.hbm [resolvable:$true] %s954_s2 }
 0x26a   : > { %s956_s15 = scalar_lea.hbm (%p311_p2), %s955_s2, 16  ;;  %p961_p0 = scmp.lt.s32.totalorder (%p311_p2), %s955_s2, %s1362_s5 }
 0x26b   : > { %p957_p11 = scmp.ne.s32.totalorder (%p311_p2), %s955_s2, %s956_s15  ;;  %p962_p3 = scmp.lt.s32.totalorder (%p311_p2), %s960_s22, %s956_s15 }
 0x26d   : > { %p958_p12 = pnand %p957_p11, %p1135_p7  ;;  %p963_p5 = por %p962_p3, %p961_p0 }
 0x26f   : > { %p959_p13 = pneg %p958_p12 }
 0x271   : > { %p964_p8 = pnand %p963_p5, %p959_p13 }
 0x273   : > { %967 = shalt.err (!%p964_p8)
}
 0x274   : > { %s1030_s9 = smov 128   ;;  %s1031_s11 = smov 8  }
 0x275   : > { %787 = dma.vmem_to_hbm [thread:$0]  (%p1135_p7), %s603_s30, 256, %s605_s1, %s590_s12, %s1030_s9, %s1030_s9, %s1031_s11  }
 0x276 PF: > { %s619_s10 = sand.u32 1, %s1006_s18   ;;  %p1374_p1 = scmp.ge.s32.totalorder %s1018_s21, 2 }
 0x277   : > { %s620_s6 = scalar_lea.sflag [#allocation4], %s619_s10 }
 0x278   : > { %p804_p4 = pnand %p1374_p1, %p1097_p6 }
 0x27a   : > { %p805_p9 = pneg %p804_p4 }
 0x27c   : > { %1001 = dma.done.wait (%p805_p9), %s620_s6, 256  }
 0x27d   : > { %1003 = vsyncadd (%p805_p9), %s620_s6, 4294967040  ;;  %p20_p10 = scmp.ge.s32.totalorder %s1121_s14, 4   ;;  %s1375_s18 = smov %s1010_s19 }
 0x27e   : > { %s1376_s19 = smov %s1014_s20  ;;  %s1377_s20 = smov %s1131_s17 }
 0x27f   : > { %s1378_s21 = smov %s1121_s14  ;;  %22 = sbr.rel (!%p20_p10) target bundleno = 11 (0xb), region = 135 }
 0x284   :  { %626 = vsyncpa [#allocation3], 1 }
 0x285   :  { %628 = vsyncpa [#allocation3 + $0x1], 1 }
 0x286   :  { %629 = vsyncpa [#allocation4], 1 }
 0x287   :  { %631 = vsyncpa [#allocation4 + $0x1], 1 }
 0x288   :  { %632 = vsyncpa [#allocation5], 1 }
 0x289   :  { %634 = vsyncpa [#allocation5 + $0x1], 1 }
 0x28a   :  { %635 = vsyncpa [#allocation7], 1 }

</bundles_post_ra>
